<compile_context>
chip_gen: v7x
topology: tpu7x:2x2x1
jax: 0.10.0
libtpu: 0.0.40
codegen_flags: <defaults>
</compile_context>

<pallas_src>
import jax
import jax.numpy as jnp
from jax.experimental import pallas as pl
from jax.experimental.pallas import tpu as pltpu


def _round_up(v, m):
    return (v + m - 1) // m * m


def adain1d_kernel(x_ref, g_ref, b_ref, o_ref):
    # x_ref: (ROWS, T) slab of flattened (B*C, T) input.
    # g_ref, b_ref: (ROWS, 1) per-row gamma / beta columns (already include fc).
    x = x_ref[...].astype(jnp.float32)
    gamma = g_ref[...]            # f32 (ROWS, 1)
    beta = b_ref[...]             # f32 (ROWS, 1)

    inv_t = 1.0 / x.shape[-1]
    # One-pass statistics: E[x], E[x^2]  (biased variance, PyTorch default).
    e_x = jnp.sum(x, axis=-1, keepdims=True) * inv_t          # (ROWS, 1)
    e_x2 = jnp.sum(x * x, axis=-1, keepdims=True) * inv_t     # (ROWS, 1)
    var = jnp.maximum(e_x2 - e_x * e_x, 0.0)
    inv_std = jax.lax.rsqrt(var + 1e-5)                        # EUP

    # (1 + gamma) * (x - mean) * inv_std + beta == x * scale + shift
    scale = (1.0 + gamma) * inv_std                            # (ROWS, 1)
    shift = beta - e_x * scale                                 # (ROWS, 1)
    o_ref[...] = (x * scale + shift).astype(o_ref.dtype)


def adain1d(x, s, w, bias, *, max_tile_bytes=4 * 1024 * 1024):
    """AdaIN1d forward.

    x: (B, C, T), s: (B, S), w: (2C, S) PyTorch Linear weight, bias: (2C,).
    """
    B, C, T = x.shape
    S = s.shape[1]
    assert w.shape == (2 * C, S)
    assert bias.shape == (2 * C,)

    # --- fc hoisted out of the kernel: one batched matmul in f32 -------------
    h = (s.astype(jnp.float32) @ w.astype(jnp.float32).T
         + bias.astype(jnp.float32))                        # (B, 2C)
    gamma = h[:, :C].reshape(B * C, 1)                      # (B*C, 1) f32
    beta = h[:, C:].reshape(B * C, 1)                       # (B*C, 1) f32

    # --- flatten to (rows, T) and pick a lane-dense row tile -----------------
    R = B * C
    x_flat = x.reshape(R, T)

    # Cap the x tile at ~max_tile_bytes (fits default scoped VMEM with
    # double-buffered in+out tiles on all of v5e/v6e/v7x).
    rows_cap = max(8, (max_tile_bytes // (T * 4)) // 8 * 8)
    if R >= 16:
        # At least 2 grid steps so v7x can shard rows across both TensorCores.
        rows = min(rows_cap, _round_up(-(-R // 2), 8))
    else:
        rows = R                                            # single full-dim tile

    R_pad = _round_up(R, rows)
    num_tiles = R_pad // rows

    if R_pad != R:
        pad = R_pad - R
        x_flat = jnp.pad(x_flat, ((0, pad), (0, 0)))
        gamma = jnp.pad(gamma, ((0, pad), (0, 0)))
        beta = jnp.pad(beta, ((0, pad), (0, 0)))

    # TODO(synk): if real workloads have ragged / non-multiple-of-128 T, pad T
    # in the wrapper (with masked statistics) for fully lane-dense stores.

    out_flat = pl.pallas_call(
        adain1d_kernel,
        out_shape=jax.ShapeDtypeStruct((R_pad, T), x.dtype),
        grid_spec=pl.GridSpec(
            grid=(num_tiles,),
            in_specs=[
                pl.BlockSpec((rows, T), lambda i: (i, 0)),
                pl.BlockSpec((rows, 1), lambda i: (i, 0)),
                pl.BlockSpec((rows, 1), lambda i: (i, 0)),
            ],
            out_specs=pl.BlockSpec((rows, T), lambda i: (i, 0)),
        ),
        compiler_params=pltpu.CompilerParams(
            dimension_semantics=("parallel",),
        ),
    )(x_flat, gamma, beta)

    return out_flat[:R].reshape(B, C, T)


def adain1d_reference(x, s, w, bias):
    # Pure-JAX reference mirroring the PyTorch module.
    h = s @ w.T + bias                      # (B, 2C)
    C = x.shape[1]
    gamma = h[:, :C][:, :, None]            # (B, C, 1)
    beta = h[:, C:][:, :, None]             # (B, C, 1)
    mean = jnp.mean(x, axis=-1, keepdims=True)
    var = jnp.mean(jnp.square(x - mean), axis=-1, keepdims=True)
    x_norm = (x - mean) * jax.lax.rsqrt(var + 1e-5)
    return (1.0 + gamma) * x_norm + beta


if __name__ == "__main__":
    B, C, T, S = 2, 8, 256, 32   # batch, num_features, seq len, style_dim

    key = jax.random.PRNGKey(0)
    kx, ks, kw, kb = jax.random.split(key, 4)

    x = jax.random.normal(kx, (B, C, T), dtype=jnp.float32)
    s = jax.random.normal(ks, (B, S), dtype=jnp.float32)

    # nn.Linear(style_dim, 2*num_features) parameters.
    w = jax.random.normal(kw, (2 * C, S), dtype=jnp.float32) * (1.0 / jnp.sqrt(S))
    bias = jax.random.normal(kb, (2 * C,), dtype=jnp.float32) * 0.1

    out = adain1d(x, s, w, bias)
    out = jax.block_until_ready(out)

    ref = adain1d_reference(x, s, w, bias)
    assert out.shape == (B, C, T)
    assert jnp.allclose(out, ref, atol=1e-4, rtol=1e-4), "mismatch vs reference"

    print("KERNEL_OK")
</pallas_src>

<mosaic_0001>
module attributes {stable_mosaic.version = 11 : i64} {
  func.func @adain1d_kernel(%arg0: i32, %arg1: memref<8x256xf32, #tpu.memory_space<vmem>>, %arg2: memref<8x1xf32, #tpu.memory_space<vmem>>, %arg3: memref<8x1xf32, #tpu.memory_space<vmem>>, %arg4: memref<8x256xf32, #tpu.memory_space<vmem>>) attributes {dimension_semantics = [#tpu.dimension_semantics<parallel>], iteration_bounds = array<i64: 2>, scalar_prefetch = 0 : i64, scratch_operands = 0 : i64, tpu.core_type = #tpu.core_type<tc>, window_params = [{transform_indices = @transform_0, window_bounds = array<i64: 8, 256>}, {transform_indices = @transform_1, window_bounds = array<i64: 8, 1>}, {transform_indices = @transform_2, window_bounds = array<i64: 8, 1>}, {transform_indices = @transform_3, window_bounds = array<i64: 8, 256>}]} {
    %c0 = arith.constant 0 : index
    %c0_0 = arith.constant 0 : index
    %0 = vector.load %arg1[%c0, %c0_0] : memref<8x256xf32, #tpu.memory_space<vmem>>, vector<8x256xf32>
    %c0_1 = arith.constant 0 : index
    %c0_2 = arith.constant 0 : index
    %1 = vector.load %arg2[%c0_1, %c0_2] : memref<8x1xf32, #tpu.memory_space<vmem>>, vector<8x1xf32>
    %c0_3 = arith.constant 0 : index
    %c0_4 = arith.constant 0 : index
    %2 = vector.load %arg3[%c0_3, %c0_4] : memref<8x1xf32, #tpu.memory_space<vmem>>, vector<8x1xf32>
    %cst = arith.constant dense<0.000000e+00> : vector<8xf32>
    %3 = vector.multi_reduction <add>, %0, %cst [1] : vector<8x256xf32> to vector<8xf32>
    %4 = vector.shape_cast %3 : vector<8xf32> to vector<8x1xf32>
    %cst_5 = arith.constant 3.906250e-03 : f32
    %5 = vector.broadcast %cst_5 : f32 to vector<8x1xf32>
    %6 = arith.mulf %4, %5 : vector<8x1xf32>
    %7 = arith.mulf %0, %0 : vector<8x256xf32>
    %cst_6 = arith.constant dense<0.000000e+00> : vector<8xf32>
    %8 = vector.multi_reduction <add>, %7, %cst_6 [1] : vector<8x256xf32> to vector<8xf32>
    %9 = vector.shape_cast %8 : vector<8xf32> to vector<8x1xf32>
    %cst_7 = arith.constant 3.906250e-03 : f32
    %10 = vector.broadcast %cst_7 : f32 to vector<8x1xf32>
    %11 = arith.mulf %9, %10 : vector<8x1xf32>
    %12 = arith.mulf %6, %6 : vector<8x1xf32>
    %13 = arith.subf %11, %12 : vector<8x1xf32>
    %cst_8 = arith.constant 0.000000e+00 : f32
    %14 = vector.broadcast %cst_8 : f32 to vector<8x1xf32>
    %15 = arith.maximumf %13, %14 : vector<8x1xf32>
    %cst_9 = arith.constant 9.99999974E-6 : f32
    %16 = vector.broadcast %cst_9 : f32 to vector<8x1xf32>
    %17 = arith.addf %15, %16 : vector<8x1xf32>
    %18 = math.rsqrt %17 : vector<8x1xf32>
    %cst_10 = arith.constant 1.000000e+00 : f32
    %19 = vector.broadcast %cst_10 : f32 to vector<8x1xf32>
    %20 = arith.addf %19, %1 : vector<8x1xf32>
    %21 = arith.mulf %20, %18 : vector<8x1xf32>
    %22 = arith.mulf %6, %21 : vector<8x1xf32>
    %23 = arith.subf %2, %22 : vector<8x1xf32>
    %24 = vector.broadcast %21 : vector<8x1xf32> to vector<8x256xf32>
    %25 = arith.mulf %0, %24 : vector<8x256xf32>
    %26 = vector.broadcast %23 : vector<8x1xf32> to vector<8x256xf32>
    %27 = arith.addf %25, %26 : vector<8x256xf32>
    %c0_11 = arith.constant 0 : index
    %c0_12 = arith.constant 0 : index
    %28 = vector.load %arg4[%c0_11, %c0_12] : memref<8x256xf32, #tpu.memory_space<vmem>>, vector<8x256xf32>
    tpu.vector_store %arg4[%c0_11, %c0_12], %27 {strides = array<i32>} : memref<8x256xf32, #tpu.memory_space<vmem>>, vector<8x256xf32>,
    return
  }
  func.func @transform_0(%arg0: i32) -> (i32, i32) {
    %c0_i32 = arith.constant 0 : i32
    %c0_i32_0 = arith.constant 0 : i32
    return %arg0, %c0_i32 : i32, i32
  }
  func.func @transform_1(%arg0: i32) -> (i32, i32) {
    %c0_i32 = arith.constant 0 : i32
    %c0_i32_0 = arith.constant 0 : i32
    return %arg0, %c0_i32 : i32, i32
  }
  func.func @transform_2(%arg0: i32) -> (i32, i32) {
    %c0_i32 = arith.constant 0 : i32
    %c0_i32_0 = arith.constant 0 : i32
    return %arg0, %c0_i32 : i32, i32
  }
  func.func @transform_3(%arg0: i32) -> (i32, i32) {
    %c0_i32 = arith.constant 0 : i32
    %c0_i32_0 = arith.constant 0 : i32
    return %arg0, %c0_i32 : i32, i32
  }
}

</mosaic_0001>

<bundles_post_ra>
// kernel: tpu_custom_call.1
= control target key start
LH: loop header
LB: loop body
LE: loop exit
PB: predicated region body
PF: predicated region fallthrough
CT: control target
= control target key end

     0   :  { %8 = vsyncpa [#allocation3], 0  ;;  %s592_s0 = inlined_call_operand.vmem [shape: f32[16,256], index: 0, kind: input, shape index: {}]   ;;  %s593_s1 = inlined_call_operand.vmem [shape: f32[16,1], index: 1, kind: input, shape index: {}]   ;;  %s594_s2 = inlined_call_operand.vmem [shape: f32[16,1], index: 2, kind: input, shape index: {}]   ;;  %s595_s3 = inlined_call_operand.hbm [shape: f32[16,256], index: 3, kind: output, shape index: {}]  }
   0x1   :  { %10 = vsyncpa [#allocation3 + $0x1], 0  ;;  %s486_s12 = smov 0   ;;  %s488_s13 = smov 0  }
   0x2   :  { %s490_s14 = smov 0   ;;  %s492_s15 = smov 0  }
   0x3 LB: > { %s507_s16 = sadd.s32 4294967295, %s462_s15   ;;  %s340_s17 = sadd.s32 4294967294, %s462_s15   ;;  %s462_s15 = sphi %s492_s15, %s601_s15   ;;  %s458_s14 = sphi %s490_s14, %s600_s14   ;;  %s454_s13 = sphi %s488_s13, %s599_s13   ;;  %s450_s12 = sphi %s486_s12, %s598_s12  }
   0x4   : > { %s511_s18 = sadd.s32 1, %s462_s15   ;;  %s101_s19 = sadd.s32 1, %s458_s14 }
   0x5   : > { %s98_s20 = ssub.s32 %s462_s15, %s511_s18  ;;  %p111_p0 = scmp.ne.s32.totalorder %s458_s14, %s454_s13 }
   0x6   : > { %p99_p1 = scmp.eq.s32.totalorder %s98_s20, 0  ;;  %p112_p2 = scmp.eq.s32.totalorder %s507_s16, 1 }
   0x7   : > { %p117_p3 = scmp.ne.s32.totalorder %s454_s13, %s450_s12  ;;  %p118_p4 = scmp.eq.s32.totalorder %s340_s17, 1 }
   0x8   : > { %s522_s21 = scalar_select %p99_p1, %s458_s14, %s101_s19  }
   0x9   : > { %p524_p5 = por %p112_p2, %p111_p0  ;;  %p528_p6 = por %p118_p4, %p117_p3 }
   0xa   : > { %p343_p7 = scmp.ge.s32.totalorder %s462_s15, 1  ;;  %p158_p8 = scmp.lt.s32.totalorder %s462_s15, 3 }
   0xc   : > { %p159_p9 = pnand %p343_p7, %p158_p8 }
   0xd   : > { %p190_p10 = scmp.lt.s32.totalorder (!%p159_p9), %s507_s16, 1  ;;  %v464_v6 = vmov (!%p159_p9), 0   ;;  %s187_s9 = sand.u32 (!%p159_p9), 1, %s454_s13  }
   0xe   : > { %162 = sbr.rel (%p159_p9) target bundleno = 343 (0x157), region = 32  ;;  %396 = vset.pattern.permute.xlu1 (!%p159_p9), %v464_v6  ;;  %397 = vset.pattern.permute.xlu0 (!%p159_p9), %v464_v6  ;;  %s344_s10 = sshll.u32 (!%p159_p9), %s187_s9, 4 }
   0xf   : > { %s355_s11 = sshll.u32 (!%p159_p9), %s507_s16, 8  ;;  %s189_s17 = scalar_lea.vmem (!%p159_p9), [#allocation2], %s344_s10 }
  0x10   : > { %s257_s19 = sshll.u32 (!%p159_p9), %s189_s17, 4  ;;  %s465_s27 = smov (!%p159_p9), [#allocation2]   ;;  %s552_s19 = int_to_ptr.vmem [resolvable:$true] %s257_s19 }
  0x11   : > { %s400_s26 = scalar_lea.vmem (!%p159_p9), %s552_s19, 256 }
  0x12   : > { %p401_p11 = scmp.ne.s32.totalorder (!%p159_p9), %s552_s19, %s400_s26 }
  0x14   : > { %p402_p12 = pnand (!%p159_p9), %p401_p11, %p524_p5 }
  0x15   : > { %s191_s24 = scalar_select %p190_p10, %s507_s16, 1 }
  0x16   : > { %s243_s16 = scalar_lea.sflag [#allocation3], %s187_s9  ;;  %p403_p13 = pneg %p402_p12 }
  0x17   : > { %s354_s25 = sshll.u32 %s191_s24, 4  ;;  %s347_s29 = sshll.u32 %s191_s24, 3 }
  0x18   : > { %s194_s28 = scalar_lea.vmem %s592_s0, %s354_s25  ;;  %s198_s5 = scalar_lea.vmem %s593_s1, %s347_s29 }
  0x19   : > { %v203_v0 = vld [vmem:[%s194_s28] sm:$0xff]  ;;  %v204_v1 = vld [vmem:[%s194_s28 + $0x8] sm:$0xff]  ;;  %s202_s8 = scalar_lea.vmem %s594_s2, %s347_s29  ;;  %s550_s25 = scalar_lea.hbm %s595_s3, %s355_s11 }
  0x1a   : > { %v207_v2 = vadd.f32 %v204_v1, %v203_v0  ;;  %v211_v3 = vmul.f32 %v203_v0, %v203_v0  ;;  %v212_v4 = vmul.f32 %v204_v1, %v204_v1  ;;  %v205_v15 = vld [vmem:[%s198_s5] sm:$0xff]  ;;  %s404_s28 = sshll.u32 %s465_s27, 4  ;;  %s405_s28 = int_to_ptr.vmem [resolvable:$false] %s404_s28 }
  0x1b   : > { %v222_v16 = vadd.f32 1.0, %v205_v15  ;;  %v206_v19 = vld [vmem:[%s202_s8] sm:$0xff]  ;;  %s406_s29 = scalar_lea.vmem %s405_s28, 512  ;;  %p407_p0 = scmp.lt.s32.totalorder %s552_s19, %s405_s28 }
  0x1c   : > { %208 = vadd.xlane.f32.xlu0 %v207_v2  ;;  %v213_v5 = vadd.f32 %v212_v4, %v211_v3  ;;  %p408_p1 = scmp.lt.s32.totalorder %s406_s29, %s400_s26 }
  0x1e   : > { %p409_p2 = por %p408_p1, %p407_p0 }
  0x20   : > { %214 = vadd.xlane.f32.xlu0 %v213_v5  ;;  %p410_p3 = pnand %p409_p2, %p403_p13 }
  0xa9   : > { %v209_v7 = vpop.xlane.xlu0 %208 }
  0xaa   : > { %v210_v8 = vmul.f32 0.00390625, %v209_v7 }
  0xac   : > { %v217_v10 = vmul.f32 %v210_v8, %v210_v8 }
  0xad   : > { %v215_v9 = vpop.xlane.xlu0 %214 }
  0xae   : > { %v216_v11 = vmul.f32 0.00390625, %v215_v9 }
  0xb0   : > { %v218_v12 = vsub.f32 %v216_v11, %v217_v10 }
  0xb2   : > { %v219_v13 = vmax.f32 %v218_v12, 0.0 }
  0xb4   : > { %v220_v14 = vadd.f32 1e-05, %v219_v13 }
  0xb6   : > { %398 = vrsqrt.f32 %v220_v14 }
  0xc0   : > { %v399_v17 = vpop.eup %398 }
  0xc1   : > { %v223_v18 = vmul.f32 %v399_v17, %v222_v16 }
  0xc3   : > { %228 = vperm.xlu1 %396, %v223_v18   ;;  %v224_v20 = vmul.f32 %v223_v18, %v210_v8 }
  0xc5   : > { %v225_v21 = vsub.f32 %v206_v19, %v224_v20 }
  0xc7   : > { %235 = vperm.xlu1 %396, %v225_v21  }
 0x142   : > { %v229_v22 = vpop.permute.xlu1 %228 }
 0x143   : > { %v231_v23 = vmul.f32 %v229_v22, %v203_v0  ;;  %v232_v24 = vmul.f32 %v229_v22, %v204_v1 }
 0x146   : > { %v236_v25 = vpop.permute.xlu1 %235 }
 0x147   : > { %v238_v26 = vadd.f32 %v236_v25, %v231_v23  ;;  %v239_v27 = vadd.f32 %v236_v25, %v232_v24 }
 0x149   : > { %240 = vst [vmem:[%s189_s17] sm:$0xff] %v238_v26  ;;  %241 = vst [vmem:[%s189_s17 + $0x8] sm:$0xff] %v239_v27 }
 0x14a   : > { %413 = shalt.err (!%p410_p3)
}
 0x14b   : > { %s414_s30 = scalar_lea.hbm %s550_s25, 256  ;;  %s418_s6 = scalar_lea.hbm %s595_s3, 512 }
 0x14c   : > { %p415_p4 = scmp.ne.s32.totalorder %s550_s25, %s414_s30  ;;  %p419_p9 = scmp.lt.u32.totalorder %s550_s25, %s595_s3 }
 0x14d   : > { %p420_p10 = scmp.lt.u32.totalorder %s418_s6, %s414_s30  ;;  %p422_p12 = scmp.lt.u32.totalorder %s414_s30, %s550_s25 }
 0x14e   : > { %p416_p7 = pnand %p415_p4, %p524_p5 }
 0x14f   : > { %p421_p11 = por %p420_p10, %p419_p9 }
 0x150   : > { %p417_p8 = pneg %p416_p7 }
 0x151   : > { %p423_p13 = por %p422_p12, %p421_p11 }
 0x153   : > { %p424_p0 = pnand %p423_p13, %p417_p8 }
 0x155   : > { %427 = shalt.err (!%p424_p0)
}
 0x156   : > { %356 = dma.vmem_to_hbm [thread:$0]  (%p524_p5), %s552_s19, 256, %s550_s25, %s243_s16  }
 0x157 PF: > { %p362_p1 = scmp.ge.s32.totalorder %s462_s15, 2  ;;  %s269_s9 = sand.u32 1, %s450_s12  }
 0x158   : > { %s270_s10 = scalar_lea.sflag [#allocation3], %s269_s9 }
 0x159   : > { %p359_p2 = pnand %p362_p1, %p528_p6 }
 0x15b   : > { %445 = dma.done.wait (!%p359_p2), %s270_s10, 256  }
 0x15c   : > { %447 = vsyncadd (!%p359_p2), %s270_s10, 4294967040  ;;  %p13_p3 = scmp.ge.s32.totalorder %s511_s18, 4   ;;  %s598_s12 = smov %s454_s13 }
 0x15d   : > { %s599_s13 = smov %s458_s14  ;;  %s600_s14 = smov %s522_s21 }
 0x15e   : > { %s601_s15 = smov %s511_s18  ;;  %15 = sbr.rel (!%p13_p3) target bundleno = 3 (0x3), region = 73 }
 0x165   :  { %275 = vsyncpa [#allocation3], 1 }
 0x166   :  { %277 = vsyncpa [#allocation3 + $0x1], 1 }

</bundles_post_ra>
